<compile_context>
chip_gen: v7x
topology: tpu7x:2x2x1
jax: 0.10.0
libtpu: 0.0.40
codegen_flags: <defaults>
</compile_context>

<pallas_src>
import numpy as np
import jax
import jax.numpy as jnp
from jax.experimental import pallas as pl
from jax.experimental.pallas import tpu as pltpu


# ---------------------------------------------------------------------------
# Host-side lowering of a 3x3 "same" conv to banded matmul weights
# ---------------------------------------------------------------------------
def conv_as_banded_matmul(wt, width):
    """Lower a 3x3 'same' conv with HWIO weights `wt` (3,3,Cin,Cout) to three
    banded matrices M[dy] of shape (W*Cin, W*Cout) such that, with rows
    lane-packed as lane = w*C + c and pad rows r = 0..H+1 (rows 0 and H+1
    all-zero, rows 1..H = image rows),  out_row[h] = sum_dy pad_row[h+dy] @ M[dy].
    Out-of-range horizontal taps read the zero pad and are simply omitted."""
    Cin, Cout = int(wt.shape[2]), int(wt.shape[3])
    mats = []
    for dy in range(3):
        m = jnp.zeros((width * Cin, width * Cout), jnp.float32)
        for dx in range(3):
            # output columns w whose input column q = w + dx - 1 is in range
            w_lo, w_hi = max(0, 1 - dx), min(width, width + 1 - dx)
            w_idx = np.arange(w_lo, w_hi)
            q_idx = w_idx + dx - 1
            n = w_idx.size
            rows = np.broadcast_to(
                q_idx[:, None, None] * Cin + np.arange(Cin)[None, :, None],
                (n, Cin, Cout))
            cols = np.broadcast_to(
                w_idx[:, None, None] * Cout + np.arange(Cout)[None, None, :],
                (n, Cin, Cout))
            vals = jnp.broadcast_to(wt[dy, dx][None, :, :], (n, Cin, Cout))
            m = m.at[rows, cols].set(vals)
        mats.append(m)
    return jnp.stack(mats).astype(jnp.bfloat16)      # (3, W*Cin, W*Cout)


# ---------------------------------------------------------------------------
# Fused ResBlock kernel (one image per grid step)
# ---------------------------------------------------------------------------
def resblock_kernel(a_ref, x_ref, m0_ref, m1_ref, m2_ref, b1_ref, b2_ref,
                    o_ref, padA, padB):
    """a_ref:  (3,)               PReLU slopes (SMEM)
       x_ref:  (1, H, W*C)        input, lane-packed rows (f32, VMEM)
       m*_ref: (3, W*Cin, W*Cout) banded conv matrices (bf16, VMEM)
       b*_ref: (1, W*Cout)        per-pixel tiled biases (f32, VMEM)
       o_ref:  (1, H, W*C)        output, lane-packed rows (f32, VMEM)
       padA:   (H+2, W*C)   bf16  staging for conv0/conv1 input rows
       padB:   (H+2, W*2C)  bf16  staging for conv2 input rows
    """
    H = x_ref.shape[1]

    # Zero only the two vertical halo rows of each staging buffer.  The
    # horizontal halo is folded into the banded matrices, and the interior
    # rows are fully overwritten below.  Re-done every step (not guarded by
    # program_id == 0) so it is correct when the batch axis is split across
    # TensorCores, each with its own scratch.
    zA = jnp.zeros((1, padA.shape[1]), padA.dtype)
    zB = jnp.zeros((1, padB.shape[1]), padB.dtype)
    padA[0:1, :] = zA
    padA[H + 1:H + 2, :] = zA
    padB[0:1, :] = zB
    padB[H + 1:H + 2, :] = zB

    a0 = a_ref[0]
    a1 = a_ref[1]
    a2 = a_ref[2]

    def conv3x3(pad_ref, m_ref, bias, alpha):
        # Three MXU matmuls over sublane-shifted row windows; f32 accumulate.
        acc = jnp.dot(pad_ref[0:H, :], m_ref[0],
                      preferred_element_type=jnp.float32)
        acc = acc + jnp.dot(pad_ref[1:H + 1, :], m_ref[1],
                            preferred_element_type=jnp.float32)
        acc = acc + jnp.dot(pad_ref[2:H + 2, :], m_ref[2],
                            preferred_element_type=jnp.float32)
        if bias is not None:
            acc = acc + bias                         # (1, W*Cout) broadcast
        # PReLU (num_parameters=1), in f32.
        return jnp.where(acc > 0, acc, acc * alpha)

    x0 = x_ref[0]                                    # (H, W*C) f32

    # conv0: C -> C, bias=False
    padA[1:H + 1, :] = x0.astype(jnp.bfloat16)       # aligned full-width rows
    x1 = conv3x3(padA, m0_ref, None, a0)             # (H, W*C)  f32

    # conv1: C -> 2C, bias=True
    padA[1:H + 1, :] = x1.astype(jnp.bfloat16)
    x2 = conv3x3(padA, m1_ref, b1_ref[...], a1)      # (H, W*2C) f32

    # conv2: 2C -> C, bias=True
    padB[1:H + 1, :] = x2.astype(jnp.bfloat16)
    x3 = conv3x3(padB, m2_ref, b2_ref[...], a2)      # (H, W*C)  f32

    # residual skip: out = x + x3 (f32, lane-packed -> dense store)
    o_ref[0] = x0 + x3


# ---------------------------------------------------------------------------
# Wrapper: NCHW in / NCHW out
# ---------------------------------------------------------------------------
def resblock_forward(x_nchw, p):
    """x_nchw: (N, C, H, W) -> (N, C, H, W), matching ResBlock.forward."""
    x = jnp.transpose(x_nchw, (0, 2, 3, 1)).astype(jnp.float32)      # NHWC
    N, H, W, C = x.shape
    C2 = 2 * C
    x_packed = x.reshape(N, H, W * C)       # lane-packed rows (pure metadata)

    # Host-side "layout plumbing": banded conv matrices + per-pixel biases.
    m0 = conv_as_banded_matmul(p["w0"], W)                  # (3, W*C,  W*C)
    m1 = conv_as_banded_matmul(p["w1"], W)                  # (3, W*C,  W*C2)
    m2 = conv_as_banded_matmul(p["w2"], W)                  # (3, W*C2, W*C)
    b1 = jnp.tile(jnp.asarray(p["b1"], jnp.float32), (W,)).reshape(1, W * C2)
    b2 = jnp.tile(jnp.asarray(p["b2"], jnp.float32), (W,)).reshape(1, W * C)
    alphas = jnp.asarray([p["a0"], p["a1"], p["a2"]], jnp.float32)

    out = pl.pallas_call(
        resblock_kernel,
        out_shape=jax.ShapeDtypeStruct((N, H, W * C), jnp.float32),
        grid=(N,),
        in_specs=[
            pl.BlockSpec(memory_space=pltpu.MemorySpace.SMEM),        # alphas
            pl.BlockSpec((1, H, W * C), lambda n: (n, 0, 0)),         # x
            pl.BlockSpec((3, W * C, W * C), lambda n: (0, 0, 0)),     # m0
            pl.BlockSpec((3, W * C, W * C2), lambda n: (0, 0, 0)),    # m1
            pl.BlockSpec((3, W * C2, W * C), lambda n: (0, 0, 0)),    # m2
            pl.BlockSpec((1, W * C2), lambda n: (0, 0)),              # b1
            pl.BlockSpec((1, W * C), lambda n: (0, 0)),               # b2
        ],
        out_specs=pl.BlockSpec((1, H, W * C), lambda n: (n, 0, 0)),
        scratch_shapes=[
            pltpu.VMEM((H + 2, W * C), jnp.bfloat16),                 # padA
            pltpu.VMEM((H + 2, W * C2), jnp.bfloat16),                # padB
        ],
        compiler_params=pltpu.CompilerParams(
            dimension_semantics=("parallel",)),
    )(alphas, x_packed, m0, m1, m2, b1, b2)

    return jnp.transpose(out.reshape(N, H, W, C), (0, 3, 1, 2))       # NCHW


# ---------------------------------------------------------------------------
# Parameters (deterministic, matching ResBlock.__init__ shapes) + reference
# ---------------------------------------------------------------------------
def make_resblock_params(key, channels):
    C = channels
    ks = jax.random.split(key, 5)

    def w(k, ci, co):  # HWIO layout
        return jax.random.normal(k, (3, 3, ci, co), jnp.float32) * (1.0 / (9 * ci)) ** 0.5

    return {
        "w0": w(ks[0], C, C), "a0": jnp.float32(0.2),                 # bias=False
        "w1": w(ks[1], C, 2 * C),
        "b1": jax.random.normal(ks[2], (2 * C,), jnp.float32) * 0.1,
        "a1": jnp.float32(0.2),
        "w2": w(ks[3], 2 * C, C),
        "b2": jax.random.normal(ks[4], (C,), jnp.float32) * 0.1,
        "a2": jnp.float32(0.2),
    }


def _ref_forward(x_nchw, p):
    """Pure-JAX reference of ResBlock.forward (sanity check only)."""
    x = jnp.transpose(x_nchw, (0, 2, 3, 1))

    def conv(h, w, b, a):
        y = jax.lax.conv_general_dilated(
            h, w, (1, 1), "SAME",
            dimension_numbers=("NHWC", "HWIO", "NHWC"))
        if b is not None:
            y = y + b
        return jnp.where(y > 0, y, a * y)

    x1 = conv(x, p["w0"], None, p["a0"])
    x2 = conv(x1, p["w1"], p["b1"], p["a1"])
    x3 = conv(x2, p["w2"], p["b2"], p["a2"])
    return jnp.transpose(x + x3, (0, 3, 1, 2))


# ---------------------------------------------------------------------------
if __name__ == "__main__":
    key = jax.random.PRNGKey(0)
    kx, kp = jax.random.split(key)

    N, C, H, W = 2, 4, 16, 16                # ResBlock requires in_ch == out_ch
    x = jax.random.normal(kx, (N, C, H, W), jnp.float32)
    params = make_resblock_params(kp, C)

    out = jax.block_until_ready(resblock_forward(x, params))
    assert out.shape == (N, C, H, W), out.shape

    ref = jax.block_until_ready(_ref_forward(x, params))
    max_err = float(jnp.max(jnp.abs(out - ref)))
    assert max_err < 5e-2, f"max abs error too large: {max_err}"

    print("KERNEL_OK")
</pallas_src>

<mosaic_0001>
module attributes {stable_mosaic.version = 11 : i64} {
  func.func @resblock_kernel(%arg0: i32, %arg1: memref<3xf32, #tpu.memory_space<smem>>, %arg2: memref<1x16x64xf32, #tpu.memory_space<vmem>>, %arg3: memref<3x64x64xbf16, #tpu.memory_space<vmem>>, %arg4: memref<3x64x128xbf16, #tpu.memory_space<vmem>>, %arg5: memref<3x128x64xbf16, #tpu.memory_space<vmem>>, %arg6: memref<1x128xf32, #tpu.memory_space<vmem>>, %arg7: memref<1x64xf32, #tpu.memory_space<vmem>>, %arg8: memref<1x16x64xf32, #tpu.memory_space<vmem>>, %arg9: memref<18x64xbf16, #tpu.memory_space<vmem>>, %arg10: memref<18x128xbf16, #tpu.memory_space<vmem>>) attributes {dimension_semantics = [#tpu.dimension_semantics<parallel>], iteration_bounds = array<i64: 2>, scalar_prefetch = 0 : i64, scratch_operands = 2 : i64, tpu.core_type = #tpu.core_type<tc>, window_params = [{transform_indices = @transform_0, window_bounds = array<i64: 3>}, {transform_indices = @transform_1, window_bounds = array<i64: 1, 16, 64>}, {pipeline_mode = #tpu.pipeline_mode<synchronous>, transform_indices = @transform_2, window_bounds = array<i64: 3, 64, 64>}, {pipeline_mode = #tpu.pipeline_mode<synchronous>, transform_indices = @transform_3, window_bounds = array<i64: 3, 64, 128>}, {pipeline_mode = #tpu.pipeline_mode<synchronous>, transform_indices = @transform_4, window_bounds = array<i64: 3, 128, 64>}, {pipeline_mode = #tpu.pipeline_mode<synchronous>, transform_indices = @transform_5, window_bounds = array<i64: 1, 128>}, {pipeline_mode = #tpu.pipeline_mode<synchronous>, transform_indices = @transform_6, window_bounds = array<i64: 1, 64>}, {transform_indices = @transform_7, window_bounds = array<i64: 1, 16, 64>}]} {
    %cst = arith.constant 0.000000e+00 : bf16
    %0 = vector.broadcast %cst : bf16 to vector<1x64xbf16>
    %cst_0 = arith.constant 0.000000e+00 : bf16
    %1 = vector.broadcast %cst_0 : bf16 to vector<1x128xbf16>
    %c0 = arith.constant 0 : index
    %c0_1 = arith.constant 0 : index
    %2 = vector.load %arg9[%c0, %c0_1] : memref<18x64xbf16, #tpu.memory_space<vmem>>, vector<1x64xbf16>
    tpu.vector_store %arg9[%c0, %c0_1], %0 {strides = array<i32>} : memref<18x64xbf16, #tpu.memory_space<vmem>>, vector<1x64xbf16>,
    %c17 = arith.constant 17 : index
    %c0_2 = arith.constant 0 : index
    %3 = vector.load %arg9[%c17, %c0_2] : memref<18x64xbf16, #tpu.memory_space<vmem>>, vector<1x64xbf16>
    tpu.vector_store %arg9[%c17, %c0_2], %0 {strides = array<i32>} : memref<18x64xbf16, #tpu.memory_space<vmem>>, vector<1x64xbf16>,
    %c0_3 = arith.constant 0 : index
    %c0_4 = arith.constant 0 : index
    %4 = vector.load %arg10[%c0_3, %c0_4] : memref<18x128xbf16, #tpu.memory_space<vmem>>, vector<1x128xbf16>
    tpu.vector_store %arg10[%c0_3, %c0_4], %1 {strides = array<i32>} : memref<18x128xbf16, #tpu.memory_space<vmem>>, vector<1x128xbf16>,
    %c17_5 = arith.constant 17 : index
    %c0_6 = arith.constant 0 : index
    %5 = vector.load %arg10[%c17_5, %c0_6] : memref<18x128xbf16, #tpu.memory_space<vmem>>, vector<1x128xbf16>
    tpu.vector_store %arg10[%c17_5, %c0_6], %1 {strides = array<i32>} : memref<18x128xbf16, #tpu.memory_space<vmem>>, vector<1x128xbf16>,
    %c0_7 = arith.constant 0 : index
    %6 = memref.load %arg1[%c0_7] : memref<3xf32, #tpu.memory_space<smem>>
    %c1 = arith.constant 1 : index
    %7 = memref.load %arg1[%c1] : memref<3xf32, #tpu.memory_space<smem>>
    %c2 = arith.constant 2 : index
    %8 = memref.load %arg1[%c2] : memref<3xf32, #tpu.memory_space<smem>>
    %c0_8 = arith.constant 0 : index
    %c0_9 = arith.constant 0 : index
    %c0_10 = arith.constant 0 : index
    %9 = vector.load %arg2[%c0_8, %c0_9, %c0_10] : memref<1x16x64xf32, #tpu.memory_space<vmem>>, vector<1x16x64xf32>
    %10 = vector.shape_cast %9 : vector<1x16x64xf32> to vector<16x64xf32>
    %11 = arith.truncf %10 : vector<16x64xf32> to vector<16x64xbf16>
    %c1_11 = arith.constant 1 : index
    %c0_12 = arith.constant 0 : index
    %12 = vector.load %arg9[%c1_11, %c0_12] : memref<18x64xbf16, #tpu.memory_space<vmem>>, vector<16x64xbf16>
    tpu.vector_store %arg9[%c1_11, %c0_12], %11 {strides = array<i32>} : memref<18x64xbf16, #tpu.memory_space<vmem>>, vector<16x64xbf16>,
    %c0_13 = arith.constant 0 : index
    %c0_14 = arith.constant 0 : index
    %13 = vector.load %arg9[%c0_13, %c0_14] : memref<18x64xbf16, #tpu.memory_space<vmem>>, vector<16x64xbf16>
    %c0_15 = arith.constant 0 : index
    %c0_16 = arith.constant 0 : index
    %c0_17 = arith.constant 0 : index
    %14 = vector.load %arg3[%c0_15, %c0_16, %c0_17] : memref<3x64x64xbf16, #tpu.memory_space<vmem>>, vector<1x64x64xbf16>
    %15 = vector.shape_cast %14 : vector<1x64x64xbf16> to vector<64x64xbf16>
    %cst_18 = arith.constant dense<0.000000e+00> : vector<16x64xf32>
    %16 = tpu.matmul %13, %15, %cst_18 {dimension_numbers = #tpu.dot_dimension_numbers<[1], [0], [0], [1], [0, 0, 1, 1], [], []>} : vector<16x64xbf16>, vector<64x64xbf16>, vector<16x64xf32> -> vector<16x64xf32>
    %c1_19 = arith.constant 1 : index
    %c0_20 = arith.constant 0 : index
    %17 = vector.load %arg9[%c1_19, %c0_20] : memref<18x64xbf16, #tpu.memory_space<vmem>>, vector<16x64xbf16>
    %c1_21 = arith.constant 1 : index
    %c0_22 = arith.constant 0 : index
    %c0_23 = arith.constant 0 : index
    %18 = vector.load %arg3[%c1_21, %c0_22, %c0_23] : memref<3x64x64xbf16, #tpu.memory_space<vmem>>, vector<1x64x64xbf16>
    %19 = vector.shape_cast %18 : vector<1x64x64xbf16> to vector<64x64xbf16>
    %cst_24 = arith.constant dense<0.000000e+00> : vector<16x64xf32>
    %20 = tpu.matmul %17, %19, %cst_24 {dimension_numbers = #tpu.dot_dimension_numbers<[1], [0], [0], [1], [0, 0, 1, 1], [], []>} : vector<16x64xbf16>, vector<64x64xbf16>, vector<16x64xf32> -> vector<16x64xf32>
    %21 = arith.addf %16, %20 : vector<16x64xf32>
    %c2_25 = arith.constant 2 : index
    %c0_26 = arith.constant 0 : index
    %22 = vector.load %arg9[%c2_25, %c0_26] : memref<18x64xbf16, #tpu.memory_space<vmem>>, vector<16x64xbf16>
    %c2_27 = arith.constant 2 : index
    %c0_28 = arith.constant 0 : index
    %c0_29 = arith.constant 0 : index
    %23 = vector.load %arg3[%c2_27, %c0_28, %c0_29] : memref<3x64x64xbf16, #tpu.memory_space<vmem>>, vector<1x64x64xbf16>
    %24 = vector.shape_cast %23 : vector<1x64x64xbf16> to vector<64x64xbf16>
    %cst_30 = arith.constant dense<0.000000e+00> : vector<16x64xf32>
    %25 = tpu.matmul %22, %24, %cst_30 {dimension_numbers = #tpu.dot_dimension_numbers<[1], [0], [0], [1], [0, 0, 1, 1], [], []>} : vector<16x64xbf16>, vector<64x64xbf16>, vector<16x64xf32> -> vector<16x64xf32>
    %26 = arith.addf %21, %25 : vector<16x64xf32>
    %cst_31 = arith.constant 0.000000e+00 : f32
    %27 = vector.broadcast %cst_31 : f32 to vector<16x64xf32>
    %28 = arith.cmpf ogt, %26, %27 : vector<16x64xf32>
    %29 = vector.broadcast %6 : f32 to vector<16x64xf32>
    %30 = arith.mulf %26, %29 : vector<16x64xf32>
    %31 = arith.select %28, %26, %30 : vector<16x64xi1>, vector<16x64xf32>
    %32 = arith.truncf %31 : vector<16x64xf32> to vector<16x64xbf16>
    %c1_32 = arith.constant 1 : index
    %c0_33 = arith.constant 0 : index
    %33 = vector.load %arg9[%c1_32, %c0_33] : memref<18x64xbf16, #tpu.memory_space<vmem>>, vector<16x64xbf16>
    tpu.vector_store %arg9[%c1_32, %c0_33], %32 {strides = array<i32>} : memref<18x64xbf16, #tpu.memory_space<vmem>>, vector<16x64xbf16>,
    %c0_34 = arith.constant 0 : index
    %c0_35 = arith.constant 0 : index
    %34 = vector.load %arg6[%c0_34, %c0_35] : memref<1x128xf32, #tpu.memory_space<vmem>>, vector<1x128xf32>
    %c0_36 = arith.constant 0 : index
    %c0_37 = arith.constant 0 : index
    %35 = vector.load %arg9[%c0_36, %c0_37] : memref<18x64xbf16, #tpu.memory_space<vmem>>, vector<16x64xbf16>
    %c0_38 = arith.constant 0 : index
    %c0_39 = arith.constant 0 : index
    %c0_40 = arith.constant 0 : index
    %36 = vector.load %arg4[%c0_38, %c0_39, %c0_40] : memref<3x64x128xbf16, #tpu.memory_space<vmem>>, vector<1x64x128xbf16>
    %37 = vector.shape_cast %36 : vector<1x64x128xbf16> to vector<64x128xbf16>
    %cst_41 = arith.constant dense<0.000000e+00> : vector<16x128xf32>
    %38 = tpu.matmul %35, %37, %cst_41 {dimension_numbers = #tpu.dot_dimension_numbers<[1], [0], [0], [1], [0, 0, 1, 1], [], []>} : vector<16x64xbf16>, vector<64x128xbf16>, vector<16x128xf32> -> vector<16x128xf32>
    %c1_42 = arith.constant 1 : index
    %c0_43 = arith.constant 0 : index
    %39 = vector.load %arg9[%c1_42, %c0_43] : memref<18x64xbf16, #tpu.memory_space<vmem>>, vector<16x64xbf16>
    %c1_44 = arith.constant 1 : index
    %c0_45 = arith.constant 0 : index
    %c0_46 = arith.constant 0 : index
    %40 = vector.load %arg4[%c1_44, %c0_45, %c0_46] : memref<3x64x128xbf16, #tpu.memory_space<vmem>>, vector<1x64x128xbf16>
    %41 = vector.shape_cast %40 : vector<1x64x128xbf16> to vector<64x128xbf16>
    %cst_47 = arith.constant dense<0.000000e+00> : vector<16x128xf32>
    %42 = tpu.matmul %39, %41, %cst_47 {dimension_numbers = #tpu.dot_dimension_numbers<[1], [0], [0], [1], [0, 0, 1, 1], [], []>} : vector<16x64xbf16>, vector<64x128xbf16>, vector<16x128xf32> -> vector<16x128xf32>
    %43 = arith.addf %38, %42 : vector<16x128xf32>
    %c2_48 = arith.constant 2 : index
    %c0_49 = arith.constant 0 : index
    %44 = vector.load %arg9[%c2_48, %c0_49] : memref<18x64xbf16, #tpu.memory_space<vmem>>, vector<16x64xbf16>
    %c2_50 = arith.constant 2 : index
    %c0_51 = arith.constant 0 : index
    %c0_52 = arith.constant 0 : index
    %45 = vector.load %arg4[%c2_50, %c0_51, %c0_52] : memref<3x64x128xbf16, #tpu.memory_space<vmem>>, vector<1x64x128xbf16>
    %46 = vector.shape_cast %45 : vector<1x64x128xbf16> to vector<64x128xbf16>
    %cst_53 = arith.constant dense<0.000000e+00> : vector<16x128xf32>
    %47 = tpu.matmul %44, %46, %cst_53 {dimension_numbers = #tpu.dot_dimension_numbers<[1], [0], [0], [1], [0, 0, 1, 1], [], []>} : vector<16x64xbf16>, vector<64x128xbf16>, vector<16x128xf32> -> vector<16x128xf32>
    %48 = arith.addf %43, %47 : vector<16x128xf32>
    %49 = vector.broadcast %34 : vector<1x128xf32> to vector<16x128xf32>
    %50 = arith.addf %48, %49 : vector<16x128xf32>
    %cst_54 = arith.constant 0.000000e+00 : f32
    %51 = vector.broadcast %cst_54 : f32 to vector<16x128xf32>
    %52 = arith.cmpf ogt, %50, %51 : vector<16x128xf32>
    %53 = vector.broadcast %7 : f32 to vector<16x128xf32>
    %54 = arith.mulf %50, %53 : vector<16x128xf32>
    %55 = arith.select %52, %50, %54 : vector<16x128xi1>, vector<16x128xf32>
    %56 = arith.truncf %55 : vector<16x128xf32> to vector<16x128xbf16>
    %c1_55 = arith.constant 1 : index
    %c0_56 = arith.constant 0 : index
    %57 = vector.load %arg10[%c1_55, %c0_56] : memref<18x128xbf16, #tpu.memory_space<vmem>>, vector<16x128xbf16>
    tpu.vector_store %arg10[%c1_55, %c0_56], %56 {strides = array<i32>} : memref<18x128xbf16, #tpu.memory_space<vmem>>, vector<16x128xbf16>,
    %c0_57 = arith.constant 0 : index
    %c0_58 = arith.constant 0 : index
    %58 = vector.load %arg7[%c0_57, %c0_58] : memref<1x64xf32, #tpu.memory_space<vmem>>, vector<1x64xf32>
    %c0_59 = arith.constant 0 : index
    %c0_60 = arith.constant 0 : index
    %59 = vector.load %arg10[%c0_59, %c0_60] : memref<18x128xbf16, #tpu.memory_space<vmem>>, vector<16x128xbf16>
    %c0_61 = arith.constant 0 : index
    %c0_62 = arith.constant 0 : index
    %c0_63 = arith.constant 0 : index
    %60 = vector.load %arg5[%c0_61, %c0_62, %c0_63] : memref<3x128x64xbf16, #tpu.memory_space<vmem>>, vector<1x128x64xbf16>
    %61 = vector.shape_cast %60 : vector<1x128x64xbf16> to vector<128x64xbf16>
    %cst_64 = arith.constant dense<0.000000e+00> : vector<16x64xf32>
    %62 = tpu.matmul %59, %61, %cst_64 {dimension_numbers = #tpu.dot_dimension_numbers<[1], [0], [0], [1], [0, 0, 1, 1], [], []>} : vector<16x128xbf16>, vector<128x64xbf16>, vector<16x64xf32> -> vector<16x64xf32>
    %c1_65 = arith.constant 1 : index
    %c0_66 = arith.constant 0 : index
    %63 = vector.load %arg10[%c1_65, %c0_66] : memref<18x128xbf16, #tpu.memory_space<vmem>>, vector<16x128xbf16>
    %c1_67 = arith.constant 1 : index
    %c0_68 = arith.constant 0 : index
    %c0_69 = arith.constant 0 : index
    %64 = vector.load %arg5[%c1_67, %c0_68, %c0_69] : memref<3x128x64xbf16, #tpu.memory_space<vmem>>, vector<1x128x64xbf16>
    %65 = vector.shape_cast %64 : vector<1x128x64xbf16> to vector<128x64xbf16>
    %cst_70 = arith.constant dense<0.000000e+00> : vector<16x64xf32>
    %66 = tpu.matmul %63, %65, %cst_70 {dimension_numbers = #tpu.dot_dimension_numbers<[1], [0], [0], [1], [0, 0, 1, 1], [], []>} : vector<16x128xbf16>, vector<128x64xbf16>, vector<16x64xf32> -> vector<16x64xf32>
    %67 = arith.addf %62, %66 : vector<16x64xf32>
    %c2_71 = arith.constant 2 : index
    %c0_72 = arith.constant 0 : index
    %68 = vector.load %arg10[%c2_71, %c0_72] : memref<18x128xbf16, #tpu.memory_space<vmem>>, vector<16x128xbf16>
    %c2_73 = arith.constant 2 : index
    %c0_74 = arith.constant 0 : index
    %c0_75 = arith.constant 0 : index
    %69 = vector.load %arg5[%c2_73, %c0_74, %c0_75] : memref<3x128x64xbf16, #tpu.memory_space<vmem>>, vector<1x128x64xbf16>
    %70 = vector.shape_cast %69 : vector<1x128x64xbf16> to vector<128x64xbf16>
    %cst_76 = arith.constant dense<0.000000e+00> : vector<16x64xf32>
    %71 = tpu.matmul %68, %70, %cst_76 {dimension_numbers = #tpu.dot_dimension_numbers<[1], [0], [0], [1], [0, 0, 1, 1], [], []>} : vector<16x128xbf16>, vector<128x64xbf16>, vector<16x64xf32> -> vector<16x64xf32>
    %72 = arith.addf %67, %71 : vector<16x64xf32>
    %73 = vector.broadcast %58 : vector<1x64xf32> to vector<16x64xf32>
    %74 = arith.addf %72, %73 : vector<16x64xf32>
    %cst_77 = arith.constant 0.000000e+00 : f32
    %75 = vector.broadcast %cst_77 : f32 to vector<16x64xf32>
    %76 = arith.cmpf ogt, %74, %75 : vector<16x64xf32>
    %77 = vector.broadcast %8 : f32 to vector<16x64xf32>
    %78 = arith.mulf %74, %77 : vector<16x64xf32>
    %79 = arith.select %76, %74, %78 : vector<16x64xi1>, vector<16x64xf32>
    %80 = arith.addf %10, %79 : vector<16x64xf32>
    %c0_78 = arith.constant 0 : index
    %c0_79 = arith.constant 0 : index
    %c0_80 = arith.constant 0 : index
    %81 = vector.load %arg8[%c0_78, %c0_79, %c0_80] : memref<1x16x64xf32, #tpu.memory_space<vmem>>, vector<1x16x64xf32>
    %82 = vector.shape_cast %81 : vector<1x16x64xf32> to vector<16x64xf32>
    %83 = vector.shape_cast %80 : vector<16x64xf32> to vector<1x16x64xf32>
    tpu.vector_store %arg8[%c0_78, %c0_79, %c0_80], %83 {strides = array<i32>} : memref<1x16x64xf32, #tpu.memory_space<vmem>>, vector<1x16x64xf32>,
    return
  }
  func.func @transform_0(%arg0: i32) -> i32 {
    %c0_i32 = arith.constant 0 : i32
    %c0_i32_0 = arith.constant 0 : i32
    return %c0_i32 : i32
  }
  func.func @transform_1(%arg0: i32) -> (i32, i32, i32) {
    %c0_i32 = arith.constant 0 : i32
    %c0_i32_0 = arith.constant 0 : i32
    %c0_i32_1 = arith.constant 0 : i32
    return %arg0, %c0_i32, %c0_i32_0 : i32, i32, i32
  }
  func.func @transform_2(%arg0: i32) -> (i32, i32, i32) {
    %c0_i32 = arith.constant 0 : i32
    %c0_i32_0 = arith.constant 0 : i32
    %c0_i32_1 = arith.constant 0 : i32
    %c0_i32_2 = arith.constant 0 : i32
    return %c0_i32, %c0_i32_0, %c0_i32_1 : i32, i32, i32
  }
  func.func @transform_3(%arg0: i32) -> (i32, i32, i32) {
    %c0_i32 = arith.constant 0 : i32
    %c0_i32_0 = arith.constant 0 : i32
    %c0_i32_1 = arith.constant 0 : i32
    %c0_i32_2 = arith.constant 0 : i32
    return %c0_i32, %c0_i32_0, %c0_i32_1 : i32, i32, i32
  }
  func.func @transform_4(%arg0: i32) -> (i32, i32, i32) {
    %c0_i32 = arith.constant 0 : i32
    %c0_i32_0 = arith.constant 0 : i32
    %c0_i32_1 = arith.constant 0 : i32
    %c0_i32_2 = arith.constant 0 : i32
    return %c0_i32, %c0_i32_0, %c0_i32_1 : i32, i32, i32
  }
  func.func @transform_5(%arg0: i32) -> (i32, i32) {
    %c0_i32 = arith.constant 0 : i32
    %c0_i32_0 = arith.constant 0 : i32
    %c0_i32_1 = arith.constant 0 : i32
    return %c0_i32, %c0_i32_0 : i32, i32
  }
  func.func @transform_6(%arg0: i32) -> (i32, i32) {
    %c0_i32 = arith.constant 0 : i32
    %c0_i32_0 = arith.constant 0 : i32
    %c0_i32_1 = arith.constant 0 : i32
    return %c0_i32, %c0_i32_0 : i32, i32
  }
  func.func @transform_7(%arg0: i32) -> (i32, i32, i32) {
    %c0_i32 = arith.constant 0 : i32
    %c0_i32_0 = arith.constant 0 : i32
    %c0_i32_1 = arith.constant 0 : i32
    return %arg0, %c0_i32, %c0_i32_0 : i32, i32, i32
  }
}

</mosaic_0001>

<bundles_post_ra>
// kernel: tpu_custom_call.1
= control target key start
LH: loop header
LB: loop body
LE: loop exit
PB: predicated region body
PF: predicated region fallthrough
CT: control target
= control target key end

     0   :  { %12 = vsyncpa [#allocation6], 0  ;;  %s2440_s0 = inlined_call_operand.vmem [shape: f32[3], index: 0, kind: input, shape index: {}]   ;;  %s2441_s1 = inlined_call_operand.vmem [shape: f32[2,16,64], index: 1, kind: input, shape index: {}]   ;;  %s2442_s2 = inlined_call_operand.vmem [shape: bf16[3,64,64], index: 2, kind: input, shape index: {}]   ;;  %s2443_s3 = inlined_call_operand.vmem [shape: bf16[3,64,128], index: 3, kind: input, shape index: {}]   ;;  %s2444_s4 = inlined_call_operand.vmem [shape: bf16[3,128,64], index: 4, kind: input, shape index: {}]   ;;  %s2445_s5 = inlined_call_operand.vmem [shape: f32[1,128], index: 5, kind: input, shape index: {}]   ;;  %s2446_s6 = inlined_call_operand.vmem [shape: f32[1,64], index: 6, kind: input, shape index: {}]   ;;  %s2447_s7 = inlined_call_operand.hbm [shape: f32[2,16,64], index: 7, kind: output, shape index: {}]  }
   0x1   :  { %13 = vsyncpa [#allocation5], 0 }
   0x2   :  { %15 = vsyncpa [#allocation5 + $0x1], 0  ;;  %s2024_s24 = smov 0   ;;  %s2026_s25 = smov 0  }
   0x3   :  { %s2028_s26 = smov 0   ;;  %s2030_s27 = smov 0  }
   0x4 LB: > { %s2045_s28 = sadd.s32 4294967295, %s1976_s27   ;;  %s1430_s29 = sadd.s32 4294967294, %s1976_s27   ;;  %s1976_s27 = sphi %s2030_s27, %s2462_s27   ;;  %s1972_s26 = sphi %s2028_s26, %s2461_s26   ;;  %s1968_s25 = sphi %s2026_s25, %s2460_s25   ;;  %s1964_s24 = sphi %s2024_s24, %s2459_s24  }
   0x5   : > { %s2049_s30 = sadd.s32 1, %s1976_s27   ;;  %s180_s8 = sadd.s32 1, %s1972_s26 }
   0x6   : > { %s177_s9 = ssub.s32 %s1976_s27, %s2049_s30  ;;  %p190_p0 = scmp.ne.s32.totalorder %s1972_s26, %s1968_s25 }
   0x7   : > { %p178_p1 = scmp.eq.s32.totalorder %s177_s9, 0  ;;  %p191_p2 = scmp.eq.s32.totalorder %s2045_s28, 1 }
   0x8   : > { %p196_p3 = scmp.ne.s32.totalorder %s1968_s25, %s1964_s24  ;;  %p197_p4 = scmp.eq.s32.totalorder %s1430_s29, 1 }
   0x9   : > { %s2060_s10 = scalar_select %p178_p1, %s1972_s26, %s180_s8  }
   0xa   : > { %p2062_p5 = por %p191_p2, %p190_p0  ;;  %p2066_p6 = por %p197_p4, %p196_p3 }
   0xb   : > { %p1431_p7 = scmp.ge.s32.totalorder %s1976_s27, 1  ;;  %p204_p8 = scmp.lt.s32.totalorder %s1976_s27, 3 }
   0xc   : > { %p1798_p9 = scmp.eq.s32.totalorder %s2045_s28, 0  ;;  %s217_s16 = sshll.u32 %s2440_s0, 4  ;;  %s218_s16 = int_to_ptr.vmem [resolvable:$true] %s217_s16 }
   0xd   : > { %p2073_p10 = pnand %p1431_p7, %p204_p8  ;;  %s1895_s17 = scalar_lea.vmem %s218_s16, 16 }
   0xe   : > { %p1896_p13 = scmp.ne.s32.totalorder %s218_s16, %s1895_s17  ;;  %p1903_p3 = scmp.lt.s32.totalorder %s218_s16, %s218_s16 }
   0xf   : > { %p1790_p11 = pneg %p2073_p10  ;;  %p1904_p4 = scmp.lt.s32.totalorder %s1895_s17, %s1895_s17 }
  0x11   : > { %p1791_p12 = pnand %p1798_p9, %p1790_p11  ;;  %p1905_p7 = por %p1904_p4, %p1903_p3 }
  0x13   : > { %p1897_p0 = pneg %p1791_p12 }
  0x15   : > { %p1898_p1 = pnand %p1897_p0, %p1896_p13 }
  0x17   : > { %p1899_p2 = pneg %p1898_p1 }
  0x19   : > { %p1906_p8 = pnand %p1905_p7, %p1899_p2 }
  0x1b   : > { %1909 = shalt.err (!%p1906_p8)
}
  0x1c   : > { %s1978_s18 = smov [#allocation4]   ;;  %253 = sbr.rel (%p2073_p10) target bundleno = 874 (0x36a), region = 48 }
  0x1d   : > { %1793 = dma.vmem_to_smem (!%p1791_p12), %s218_s16, 16, %s1978_s18, [#allocation6]  }
  0x23   : > { %1955 = dma.done.wait (%p1798_p9), [#allocation6], 16  }
  0x24   : > { %1957 = vsyncadd (%p1798_p9), [#allocation6], 4294967280 }
  0x25   : > { %259 = sfence }
  0x26   : > { %v1838_v0 = vld [vmem:[%s2442_s2] sm:$0xff]   ;;  %v1979_v1 = vmov 0.0   ;;  %v1839_v2 = vld [vmem:[%s2442_s2 + $0x8] sm:$0xff]   ;;  %vm1980_vm0 = vmmov 0   ;;  %p286_p9 = scmp.lt.s32.totalorder %s2045_s28, 1  ;;  %vm292_vm1 = vcmask 516096  }
  0x27   : > { %1658 = vmatprep.subr.bf16.mxu0 %v1979_v1  ;;  %1646 = vmatprep.subr.bf16.mxu1 %v1979_v1  ;;  %v1842_v3 = vld [vmem:[%s2442_s2 + $0x20] sm:$0xff]   ;;  %vm293_vm2 = vsmask.f32 256  ;;  %v1840_v5 = vld [vmem:[%s2442_s2 + $0x10] sm:$0xff]   ;;  %vm323_vm4 = vsmask.f32 4368 }
  0x28   : > { %1659 = vmatpush3.bf16.msra.mxu0 %v1838_v0  ;;  %1666 = vmatprep.mubr.msk.bf16.mxu0 %vm1980_vm0, %v1979_v1  ;;  %s287_s8 = scalar_select %p286_p9, %s2045_s28, 1  ;;  %v295_v4 = vld [vmem:[#allocation2] sm:$0x1]  ;;  %vm2113_vm3 = vmand %vm292_vm1, %vm293_vm2  ;;  %v1841_v8 = vld [vmem:[%s2442_s2 + $0x18] sm:$0xff]   ;;  %vm298_vm5 = vsmask.f32 7938 }
  0x29   : > { %1660 = vmatprep.subr.bf16.mxu0 %v1979_v1  ;;  %1654 = vmatprep.mubr.msk.bf16.mxu1 %vm1980_vm0, %v1979_v1  ;;  %v296_v7 = vsel %vm2113_vm3, 0, %v295_v4  ;;  %vm345_vm6 = vcmask 519168   ;;  %v1845_v13 = vld [vmem:[%s2442_s2 + $0x28] sm:$0xff]   ;;  %vm2140_vm7 = vmor %vm293_vm2, %vm323_vm4  ;;  %v1847_v20 = vld [vmem:[%s2442_s2 + $0x30] sm:$0xff]   ;;  %vm420_vm10 = vcmask 523264   ;;  %vm545_vm12 = vcmask 1046528  }
  0x2a   : > { %1647 = vmatpush3.bf16.msra.mxu1 %v1842_v3  ;;  %s1581_s14 = sshll.u32 %s287_s8, 4  ;;  %297 = vst [vmem:[#allocation2] sm:$0x1] %v296_v7  ;;  %vm2147_vm8 = vmand %vm345_vm6, %vm298_vm5  ;;  %v300_v23 = vld [vmem:[#allocation2 + $0x8] sm:$0x1]  ;;  %v1849_v28 = vld [vmem:[%s2442_s2 + $0x38] sm:$0xff]  }
  0x2b   : > { %1648 = vmatprep.subr.bf16.mxu1 %v1979_v1  ;;  %s290_s17 = scalar_lea.vmem %s2441_s1, %s1581_s14  ;;  %vm299_vm9 = vmand %vm292_vm1, %vm298_vm5  ;;  %v1844_v36 = vld [vmem:[%s2442_s2 + $0x40] sm:$0xff]   ;;  %v1846_v39 = vld [vmem:[%s2442_s2 + $0x48] sm:$0xff]   ;;  %vm383_vm11 = vsmask.f32 7424  ;;  %s312_s14 = sld [smem:[#allocation4]]  ;;  %vm303_vm15 = vcmask 1040384  }
  0x2c   : > { %1661 = vmatpush3.bf16.msra.mxu0 %v1839_v2  ;;  %v2127_v9 = vld [vmem:[%s290_s17] sm:$0xff]  ;;  %v2129_v10 = vld [vmem:[%s290_s17 + $0x8] sm:$0xff]  ;;  %v301_v30 = vsel %vm299_vm9, 0, %v300_v23  ;;  %v1848_v45 = vld [vmem:[%s2442_s2 + $0x50] sm:$0xff]   ;;  %s1439_s21 = sld [smem:[#allocation4 + $0x1]]  ;;  %s1440_s9 = sld [smem:[#allocation4 + $0x2]] }
  0x2d   : > { %1662 = vmatprep.subr.bf16.mxu0 %v1979_v1  ;;  %v1582_v11 = vpack.c.bf16 %v2127_v9, %v2127_v9  ;;  %v1583_v12 = vpack.c.bf16 %v2129_v10, %v2129_v10  ;;  %302 = vst [vmem:[#allocation2 + $0x8] sm:$0x1] %v301_v30  ;;  %v1851_v49 = vld [vmem:[%s2442_s2 + $0x58] sm:$0xff]   ;;  %v1853_v55 = vld [vmem:[%s2443_s3 + $0x20] sm:$0xff]   ;;  %v1854_v56 = vld [vmem:[%s2443_s3 + $0x28] sm:$0xff]   ;;  %s283_s13 = sand.u32 1, %s1968_s25  }
  0x2e   : > { %1649 = vmatpush3.bf16.msra.mxu1 %v1845_v13  ;;  %v1855_v57 = vld [vmem:[%s2443_s3 + $0x30] sm:$0xff]   ;;  %v1856_v58 = vld [vmem:[%s2443_s3 + $0x38] sm:$0xff]   ;;  %vm2272_vm1 = vmand %vm303_vm15, %vm293_vm2  ;;  %s1436_s16 = sshll.u32 %s283_s13, 4  ;;  %s1588_s17 = sshll.u32 %s2045_s28, 8 }
  0x2f   : > { %v326_v15 = vshrl.u32 %v1582_v11, 16  ;;  %v329_v16 = vshll.u32 %v1582_v11, 16  ;;  %v334_v17 = vshrl.u32 %v1583_v12, 16  ;;  %v337_v18 = vshll.u32 %v1583_v12, 16  ;;  %1650 = vmatprep.subr.bf16.mxu1 %v1979_v1  ;;  %vm308_vm2 = vmand %vm303_vm15, %vm298_vm5  ;;  %v1886_v14 = vld [vmem:[%s2444_s4 + $0x80] sm:$0xff]   ;;  %s285_s18 = scalar_lea.vmem [#allocation7], %s1436_s16  ;;  %s2392_s22 = scalar_lea.hbm %s2447_s7, %s1588_s17 }
  0x30   : > { %1663 = vmatpush3.bf16.msra.mxu0 %v1840_v5  ;;  %s1356_s19 = sshll.u32 %s285_s18, 4  ;;  %s2399_s28 = scalar_lea.sflag [#allocation5], %s283_s13  ;;  %s2394_s19 = int_to_ptr.vmem [resolvable:$true] %s1356_s19 }
  0x31   : > { %1664 = vmatprep.subr.bf16.mxu0 %v1979_v1  ;;  %v328_v21 = vrot.slane %v326_v15, 7  ;;  %v336_v22 = vrot.slane %v334_v17, 7  ;;  %v347_v27 = vld [vmem:[#allocation2] sm:$0xf]  ;;  %v621_v0 = vstv %s312_s14  ;;  %s1910_s23 = scalar_lea.vmem %s2394_s19, 256  ;;  %s1981_s29 = smov [#allocation7]  }
  0x32   : > { %1651 = vmatpush3.bf16.msra.mxu1 %v1847_v20  ;;  %p1911_p10 = scmp.ne.s32.totalorder %s2394_s19, %s1910_s23  ;;  %s1914_s8 = sshll.u32 %s1981_s29, 4  ;;  %s1915_s8 = int_to_ptr.vmem [resolvable:$false] %s1914_s8 }
  0x33   : > { %v331_v24 = vor.u32 %v329_v16, %v328_v21  ;;  %v332_v25 = vrot.slane %v328_v21, 4  ;;  %v339_v26 = vor.u32 %v337_v18, %v336_v22  ;;  %v341_v29 = vrot.slane %v336_v22, 4  ;;  %1652 = vmatprep.subr.bf16.mxu1 %v1979_v1  ;;  %p1917_p13 = scmp.lt.s32.totalorder %s2394_s19, %s1915_s8 }
  0x34   : > { %1665 = vmatpush3.bf16.msra.mxu0 %v1841_v8  ;;  %v352_v33 = vld [vmem:[#allocation2 + $0x8] sm:$0x1]  ;;  %p1912_p11 = pnand %p1911_p10, %p2062_p5 }
  0x35   : > { %1670 = vmatprep.subr.bf16.mxu0 %v1979_v1  ;;  %v340_v31 = vsel %vm2140_vm7, %v332_v25, %v339_v26  ;;  %v348_v32 = vsel %vm2147_vm8, %v331_v24, %v347_v27  ;;  %v353_v37 = vsel %vm2113_vm3, %v341_v29, %v352_v33 }
  0x36   : > { %349 = vst [vmem:[#allocation2] sm:$0xf] %v348_v32  ;;  %351 = vst.msk [vmem:[#allocation2 + $0x4] sm:$0xf] %vm345_vm6, %v340_v31  ;;  %1653 = vmatpush3.bf16.msra.mxu1 %v1849_v28  ;;  %p1913_p12 = pneg %p1912_p11 }
  0x37   : > { %1682 = vmatprep.subr.bf16.mxu1 %v1979_v1  ;;  %354 = vst [vmem:[#allocation2 + $0x8] sm:$0x1] %v353_v37 }
  0x3d   : > { %v2168_v34 = vld [vmem:[#allocation2] sm:$0xf]  ;;  %v356_v35 = vld [vmem:[#allocation2 + $0x4] sm:$0xf] }
  0x3e   : > { %v1451_v38 = vcombine.low %v2168_v34, %v356_v35  ;;  %v532_v41 = vld [vmem:[#allocation2] sm:$0xe]  ;;  %v1850_v46 = vld [vmem:[#allocation2 + $0x8] ss:$0 sps:$4 sm:$0x11]  }
  0x3f   : > { %v1471_v44 = vcombine.low %v532_v41, %v356_v35  ;;  %v392_v48 = vshll.u32 %v1850_v46, 16  ;;  %v547_v52 = vrot.slane %v1850_v46, 1  ;;  %v655_v25 = vld [vmem:[#allocation2 + $0x8] sm:$0x1]  ;;  %v1859_v41 = vld [vmem:[%s2443_s3] sm:$0xff]  }
  0x40   : > { %1667 = vmatmul.mubr.msk.bf16.vlgmr.msra.gmra.mrb[0].mxu0 %vm420_vm10, %v1451_v38  ;;  %v387_v40 = vshll.u32 %v1451_v38, 16  ;;  %v385_v42 = vshrl.u32 %v1451_v38, 16  ;;  %v1864_v46 = vld [vmem:[%s2443_s3 + $0x48] sm:$0xff]  }
  0x41   : > { %1671 = vmatpush3.bf16.msra.mxu0 %v1844_v36  ;;  %1678 = vmatprep.mubr.msk.bf16.mxu0 %vm1980_vm0, %v1979_v1  ;;  %v546_v50 = vrot.slane %v1471_v44, 1  ;;  %v394_v51 = vrot.slane %v392_v48, 1  ;;  %v1862_v44 = vld [vmem:[%s2443_s3 + $0x18] sm:$0xff]  }
  0x42   : > { %1672 = vmatprep.subr.bf16.mxu0 %v1979_v1  ;;  %v389_v43 = vrot.slane %v387_v40, 1 }
  0x43   : > { %v548_v54 = vsel %vm545_vm12, %v546_v50, %v547_v52  ;;  %v1866_v50 = vld [vmem:[%s2443_s3 + $0x58] sm:$0xff]  }
  0x44   : > { %v390_v47 = vor.u32 %v389_v43, %v385_v42  ;;  %v1860_v42 = vld [vmem:[%s2443_s3 + $0x8] sm:$0xff]   ;;  %v1861_v43 = vld [vmem:[%s2443_s3 + $0x10] sm:$0xff]  }
  0x45   : > { %1673 = vmatpush3.bf16.msra.mxu0 %v1846_v39 }
  0x46   : > { %1674 = vmatprep.subr.bf16.mxu0 %v1979_v1  ;;  %v395_v53 = vsel %vm383_vm11, %v390_v47, %v394_v51  ;;  %v1865_v47 = vld [vmem:[%s2443_s3 + $0x50] sm:$0xff]  }
  0x47   : > { %1655 = vmatmul.mubr.msk.bf16.vlgmr.msra.gmra.mrb[0].mxu1 %vm420_vm10, %v395_v53 }
  0x48   : > { %1690 = vmatprep.mubr.msk.bf16.mxu1 %vm1980_vm0, %v1979_v1  ;;  %1683 = vmatpush3.bf16.msra.mxu1 %v1853_v55  ;;  %v305_v55 = vld [vmem:[#allocation3] sm:$0x1] }
  0x49   : > { %1675 = vmatpush3.bf16.msra.mxu0 %v1848_v45  ;;  %1684 = vmatprep.subr.bf16.mxu1 %v1979_v1  ;;  %v1863_v45 = vld [vmem:[%s2443_s3 + $0x40] sm:$0xff]  }
  0x4a   : > { %1676 = vmatprep.subr.bf16.mxu0 %v1979_v1 }
  0x4c   : > { %1685 = vmatpush3.bf16.msra.mxu1 %v1854_v56 }
  0x4d   : > { %1677 = vmatpush3.bf16.msra.mxu0 %v1851_v49  ;;  %1686 = vmatprep.subr.bf16.mxu1 %v1979_v1 }
  0x4e   : > { %1718 = vmatprep.subr.bf16.mxu0 %v1979_v1 }
  0x50   : > { %1679 = vmatmul.mubr.msk.bf16.vlgmr.msra.gmra.mrb[0].mxu0 %vm420_vm10, %v548_v54  ;;  %1687 = vmatpush3.bf16.msra.mxu1 %v1855_v57  ;;  %v1868_v54 = vld [vmem:[%s2444_s4] sm:$0xff]   ;;  %v306_v57 = vsel %vm2272_vm1, 0, %v305_v55 }
  0x51   : > { %1734 = vmatprep.mubr.msk.bf16.mxu0 %vm1980_vm0, %v1979_v1  ;;  %1688 = vmatprep.subr.bf16.mxu1 %v1979_v1  ;;  %307 = vst [vmem:[#allocation3] sm:$0x1] %v306_v57 }
  0x54   : > { %1689 = vmatpush3.bf16.msra.mxu1 %v1856_v58  ;;  %v1869_v58 = vld [vmem:[%s2444_s4 + $0x8] sm:$0xff]  }
  0x55   : > { %1694 = vmatprep.subr.bf16.mxu1 %v1979_v1 }
 0x11a   : > { %v458_v59 = vpop.f32.mrb[0].mxu1 }
 0x11b   : > { %v1656_v60 = vpop.f32.mrb[1].mxu1 }
 0x11c   : > { %v461_v61 = vpop.f32.mrb[2].mxu1  ;;  %v1871_v60 = vld [vmem:[%s2444_s4 + $0x10] sm:$0xff]  }
 0x11d   : > { %v1657_v62 = vpop.f32.mrb[3].mxu1 }
 0x11e   : > { %v309_v62 = vld [vmem:[#allocation3 + $0x8] sm:$0x1] }
 0x123   : > { %v610_v63 = vpop.f32.mrb[0].mxu0 }
 0x124   : > { %v1778_v2 = vadd.f32 %v610_v63, %v458_v59  ;;  %v1680_v3 = vpop.f32.mrb[1].mxu0  ;;  %v1870_v59 = vld [vmem:[%s2444_s4 + $0x40] sm:$0xff]   ;;  %v1873_v63 = vld [vmem:[%s2444_s4 + $0x18] sm:$0xff]  }
 0x125   : > { %v613_v4 = vpop.f32.mrb[2].mxu0  ;;  %1719 = vmatpush3.bf16.msra.mxu0 %v1870_v59  ;;  %v1875_v3 = vld [vmem:[%s2444_s4 + $0x20] sm:$0xff]  }
 0x126   : > { %vm619_vm13 = vcmp.gt.f32.partialorder %v1778_v2, 0.0  ;;  %v622_v5 = vmul.f32 %v1778_v2, %v621_v0  ;;  %v1779_v7 = vadd.f32 %v613_v4, %v461_v61  ;;  %v1681_v8 = vpop.f32.mrb[3].mxu0  ;;  %1720 = vmatprep.subr.bf16.mxu0 %v1979_v1  ;;  %v1872_v61 = vld [vmem:[%s2444_s4 + $0x48] sm:$0xff]   ;;  %v1876_v4 = vld [vmem:[%s2444_s4 + $0x58] sm:$0xff]  }
 0x127   : > { %v1879_v8 = vld [vmem:[%s2444_s4 + $0x30] sm:$0xff]  }
 0x128   : > { %v624_v11 = vsel %vm619_vm13, %v1778_v2, %v622_v5  ;;  %vm620_vm14 = vcmp.gt.f32.partialorder %v1779_v7, 0.0  ;;  %v623_v12 = vmul.f32 %v1779_v7, %v621_v0  ;;  %v310_v0 = vsel %vm308_vm2, 0, %v309_v62  ;;  %v1874_v2 = vld [vmem:[%s2444_s4 + $0x50] sm:$0xff]   ;;  %v1877_v5 = vld [vmem:[%s2444_s4 + $0x28] sm:$0xff]  }
 0x129   : > { %v1584_v13 = vpack.c.bf16 %v624_v11, %v624_v11  ;;  %1721 = vmatpush3.bf16.msra.mxu0 %v1872_v61  ;;  %311 = vst [vmem:[#allocation3 + $0x8] sm:$0x1] %v310_v0  ;;  %v1880_v11 = vld [vmem:[%s2444_s4 + $0x68] sm:$0xff]  }
 0x12a   : > { %v625_v15 = vsel %vm620_vm14, %v1779_v7, %v623_v12  ;;  %1722 = vmatprep.subr.bf16.mxu0 %v1979_v1  ;;  %v1878_v7 = vld [vmem:[%s2444_s4 + $0x60] sm:$0xff]   ;;  %v1881_v12 = vld [vmem:[%s2444_s4 + $0x38] sm:$0xff]  }
 0x12b   : > { %v633_v16 = vshrl.u32 %v1584_v13, 16  ;;  %v1585_v17 = vpack.c.bf16 %v625_v15, %v625_v15  ;;  %v636_v20 = vshll.u32 %v1584_v13, 16  ;;  %v1882_v13 = vld [vmem:[%s2444_s4 + $0x70] sm:$0xff]   ;;  %v1884_v15 = vld [vmem:[%s2444_s4 + $0x78] sm:$0xff]  }
 0x12d   : > { %v635_v18 = vrot.slane %v633_v16, 7  ;;  %v641_v21 = vshrl.u32 %v1585_v17, 16  ;;  %v644_v24 = vshll.u32 %v1585_v17, 16  ;;  %1723 = vmatpush3.bf16.msra.mxu0 %v1874_v2 }
 0x12e   : > { %1724 = vmatprep.subr.bf16.mxu0 %v1979_v1 }
 0x12f   : > { %v638_v22 = vor.u32 %v636_v20, %v635_v18  ;;  %v643_v23 = vrot.slane %v641_v21, 7  ;;  %v639_v26 = vrot.slane %v635_v18, 4 }
 0x131   : > { %v652_v27 = vsel %vm2147_vm8, %v638_v22, %v2168_v34  ;;  %v646_v28 = vor.u32 %v644_v24, %v643_v23  ;;  %v648_v29 = vrot.slane %v643_v23, 4  ;;  %1725 = vmatpush3.bf16.msra.mxu0 %v1876_v4  ;;  %v1887_v4 = vld [vmem:[%s2444_s4 + $0x88] sm:$0xff]  }
 0x132   : > { %653 = vst [vmem:[#allocation2] sm:$0xf] %v652_v27  ;;  %1726 = vmatprep.subr.bf16.mxu0 %v1979_v1  ;;  %v1513_v27 = vld [vmem:[%s2445_s5] ss:$0 sm:$0xff] }
 0x133   : > { %v647_v30 = vsel %vm2140_vm7, %v639_v26, %v646_v28  ;;  %v656_v31 = vsel %vm2113_vm3, %v648_v29, %v655_v25 }
 0x134   : > { %654 = vst.msk [vmem:[#allocation2 + $0x4] sm:$0xf] %vm345_vm6, %v647_v30  ;;  %657 = vst [vmem:[#allocation2 + $0x8] sm:$0x1] %v656_v31  ;;  %v930_v31 = vstv %s1439_s21  ;;  %vm961_vm6 = vcmask 1043456  }
 0x135   : > { %1727 = vmatpush3.bf16.msra.mxu0 %v1878_v7  ;;  %vm962_vm8 = vmand %vm961_vm6, %vm298_vm5  ;;  %v1889_v7 = vld [vmem:[%s2444_s4 + $0x98] sm:$0xff]  }
 0x136   : > { %1728 = vmatprep.subr.bf16.mxu0 %v1979_v1 }
 0x139   : > { %v659_v32 = vld [vmem:[#allocation2] sm:$0xf]  ;;  %1729 = vmatpush3.bf16.msra.mxu0 %v1880_v11  ;;  %v1891_v11 = vld [vmem:[%s2444_s4 + $0xa8] sm:$0xff]  }
 0x13a   : > { %v834_v48 = vld [vmem:[#allocation2] sm:$0xe]  ;;  %1730 = vmatprep.subr.bf16.mxu0 %v1979_v1 }
 0x13b   : > { %v660_v33 = vld [vmem:[#allocation2 + $0x4] sm:$0xf]  ;;  %v1858_v36 = vld [vmem:[#allocation2 + $0x8] ss:$0 sps:$4 sm:$0x11]  }
 0x13c   : > { %v1487_v35 = vcombine.low %v659_v32, %v660_v33  ;;  %v695_v38 = vshll.u32 %v1858_v36, 16  ;;  %v1507_v49 = vcombine.low %v834_v48, %v660_v33  ;;  %v848_v52 = vrot.slane %v1858_v36, 1 }
 0x13d   : > { %1731 = vmatpush3.bf16.msra.mxu0 %v1882_v13 }
 0x13e   : > { %v690_v37 = vshll.u32 %v1487_v35, 16  ;;  %v688_v19 = vshrl.u32 %v1487_v35, 16  ;;  %v697_v40 = vrot.slane %v695_v38, 1  ;;  %v847_v51 = vrot.slane %v1507_v49, 1  ;;  %1732 = vmatprep.subr.bf16.mxu0 %v1979_v1  ;;  %v967_v49 = vld [vmem:[#allocation3 + $0x8] sm:$0x1] }
 0x140   : > { %v692_v34 = vrot.slane %v690_v37, 1  ;;  %v849_v53 = vsel %vm545_vm12, %v847_v51, %v848_v52 }
 0x141   : > { %1733 = vmatpush3.bf16.msra.mxu0 %v1884_v15 }
 0x142   : > { %v693_v39 = vor.u32 %v692_v34, %v688_v19  ;;  %1758 = vmatprep.subr.bf16.mxu0 %v1979_v1 }
 0x144   : > { %v698_v6 = vsel %vm383_vm11, %v693_v39, %v697_v40 }
 0x145   : > { %1691 = vmatmul.mubr.msk.bf16.vlgmr.msra.gmra.mrb[4].mxu1 %vm420_vm10, %v698_v6 }
 0x146   : > { %1695 = vmatpush3.bf16.msra.mxu1 %v1859_v41  ;;  %1702 = vmatprep.mubr.msk.bf16.mxu1 %vm1980_vm0, %v1979_v1 }
 0x147   : > { %1696 = vmatprep.subr.bf16.mxu1 %v1979_v1 }
 0x14a   : > { %1697 = vmatpush3.bf16.msra.mxu1 %v1860_v42 }
 0x14b   : > { %1698 = vmatprep.subr.bf16.mxu1 %v1979_v1 }
 0x14e   : > { %1699 = vmatpush3.bf16.msra.mxu1 %v1861_v43 }
 0x14f   : > { %1700 = vmatprep.subr.bf16.mxu1 %v1979_v1 }
 0x152   : > { %1701 = vmatpush3.bf16.msra.mxu1 %v1862_v44 }
 0x153   : > { %1706 = vmatprep.subr.bf16.mxu1 %v1979_v1 }
 0x155   : > { %1703 = vmatmul.mubr.msk.bf16.vlgmr.msra.gmra.mrb[8].mxu1 %vm420_vm10, %v1487_v35 }
 0x156   : > { %1707 = vmatpush3.bf16.msra.mxu1 %v1863_v45  ;;  %1714 = vmatprep.mubr.msk.bf16.mxu1 %vm1980_vm0, %v1979_v1  ;;  %v963_v45 = vld [vmem:[#allocation3] sm:$0xf] }
 0x157   : > { %1708 = vmatprep.subr.bf16.mxu1 %v1979_v1 }
 0x15a   : > { %1709 = vmatpush3.bf16.msra.mxu1 %v1864_v46 }
 0x15b   : > { %1710 = vmatprep.subr.bf16.mxu1 %v1979_v1 }
 0x15e   : > { %1711 = vmatpush3.bf16.msra.mxu1 %v1865_v47 }
 0x15f   : > { %1712 = vmatprep.subr.bf16.mxu1 %v1979_v1 }
 0x162   : > { %1713 = vmatpush3.bf16.msra.mxu1 %v1866_v50 }
 0x163   : > { %1738 = vmatprep.subr.bf16.mxu1 %v1979_v1 }
 0x165   : > { %1715 = vmatmul.mubr.msk.bf16.vlgmr.msra.gmra.mrb[12].mxu1 %vm420_vm10, %v849_v53 }
 0x166   : > { %1754 = vmatprep.mubr.msk.bf16.mxu1 %vm1980_vm0, %v1979_v1  ;;  %1739 = vmatpush3.bf16.msra.mxu1 %v1868_v54 }
 0x167   : > { %1740 = vmatprep.subr.bf16.mxu1 %v1979_v1 }
 0x16a   : > { %1741 = vmatpush3.bf16.msra.mxu1 %v1869_v58 }
 0x16b   : > { %1742 = vmatprep.subr.bf16.mxu1 %v1979_v1 }
 0x16e   : > { %1743 = vmatpush3.bf16.msra.mxu1 %v1871_v60 }
 0x16f   : > { %1744 = vmatprep.subr.bf16.mxu1 %v1979_v1 }
 0x172   : > { %1745 = vmatpush3.bf16.msra.mxu1 %v1873_v63 }
 0x173   : > { %1746 = vmatprep.subr.bf16.mxu1 %v1979_v1 }
 0x176   : > { %1747 = vmatpush3.bf16.msra.mxu1 %v1875_v3 }
 0x177   : > { %1748 = vmatprep.subr.bf16.mxu1 %v1979_v1 }
 0x17a   : > { %1749 = vmatpush3.bf16.msra.mxu1 %v1877_v5  ;;  %v1888_v5 = vld [vmem:[%s2444_s4 + $0x90] sm:$0xff]  }
 0x17b   : > { %1750 = vmatprep.subr.bf16.mxu1 %v1979_v1 }
 0x17e   : > { %1751 = vmatpush3.bf16.msra.mxu1 %v1879_v8  ;;  %v1890_v8 = vld [vmem:[%s2444_s4 + $0xa0] sm:$0xff]  }
 0x17f   : > { %1752 = vmatprep.subr.bf16.mxu1 %v1979_v1 }
 0x182   : > { %1753 = vmatpush3.bf16.msra.mxu1 %v1881_v12  ;;  %v1892_v12 = vld [vmem:[%s2444_s4 + $0xb0] sm:$0xff]  }
 0x218   : > { %v760_v16 = vpop.f32.mrb[4].mxu1 }
 0x219   : > { %v1692_v17 = vpop.f32.mrb[5].mxu1 }
 0x21a   : > { %v763_v18 = vpop.f32.mrb[6].mxu1 }
 0x21b   : > { %v1693_v20 = vpop.f32.mrb[7].mxu1 }
 0x228   : > { %v827_v21 = vpop.f32.mrb[8].mxu1 }
 0x229   : > { %v828_v22 = vadd.f32 %v827_v21, %v760_v16  ;;  %v1704_v23 = vpop.f32.mrb[9].mxu1  ;;  %v1893_v16 = vld [vmem:[%s2444_s4 + $0xb8] sm:$0xff]  }
 0x22a   : > { %v830_v24 = vpop.f32.mrb[10].mxu1 }
 0x22b   : > { %v831_v25 = vadd.f32 %v830_v24, %v763_v18  ;;  %v1705_v26 = vpop.f32.mrb[11].mxu1 }
 0x238   : > { %v911_v28 = vpop.f32.mrb[12].mxu1 }
 0x239   : > { %v918_v29 = vadd.f32 %v911_v28, %v828_v22  ;;  %v1716_v30 = vpop.f32.mrb[13].mxu1 }
 0x23a   : > { %v914_v32 = vpop.f32.mrb[14].mxu1 }
 0x23b   : > { %v926_v33 = vadd.f32 %v1513_v27, %v918_v29  ;;  %v919_v35 = vadd.f32 %v914_v32, %v831_v25  ;;  %v1717_v36 = vpop.f32.mrb[15].mxu1 }
 0x23d   : > { %vm928_vm3 = vcmp.gt.f32.partialorder %v926_v33, 0.0  ;;  %v931_v37 = vmul.f32 %v930_v31, %v926_v33  ;;  %v927_v38 = vadd.f32 %v1513_v27, %v919_v35  ;;  %v1333_v35 = vstv %s1440_s9  ;;  %s1916_s9 = scalar_lea.vmem %s1915_s8, 512 }
 0x23e   : > { %p1918_p0 = scmp.lt.s32.totalorder %s1916_s9, %s1910_s23 }
 0x23f   : > { %v933_v19 = vsel %vm928_vm3, %v926_v33, %v931_v37  ;;  %vm929_vm4 = vcmp.gt.f32.partialorder %v927_v38, 0.0  ;;  %v932_v34 = vmul.f32 %v930_v31, %v927_v38 }
 0x240   : > { %v1586_v39 = vpack.c.bf16 %v933_v19, %v933_v19  ;;  %p1919_p1 = por %p1918_p0, %p1917_p13 }
 0x241   : > { %v934_v40 = vsel %vm929_vm4, %v927_v38, %v932_v34 }
 0x242   : > { %v942_v41 = vshrl.u32 %v1586_v39, 16  ;;  %v1587_v6 = vpack.c.bf16 %v934_v40, %v934_v40  ;;  %v945_v43 = vshll.u32 %v1586_v39, 16  ;;  %p1920_p2 = pnand %p1919_p1, %p1913_p12 }
 0x244   : > { %v944_v42 = vrot.slane %v942_v41, 7  ;;  %v950_v44 = vshrl.u32 %v1587_v6, 16  ;;  %v953_v48 = vshll.u32 %v1587_v6, 16 }
 0x246   : > { %v947_v46 = vor.u32 %v945_v43, %v944_v42  ;;  %v952_v47 = vrot.slane %v950_v44, 7  ;;  %v948_v50 = vrot.slane %v944_v42, 4 }
 0x248   : > { %v964_v51 = vsel %vm962_vm8, %v947_v46, %v963_v45  ;;  %v955_v52 = vor.u32 %v953_v48, %v952_v47  ;;  %v957_v53 = vrot.slane %v952_v47, 4 }
 0x249   : > { %965 = vst [vmem:[#allocation3] sm:$0xf] %v964_v51 }
 0x24a   : > { %v956_v54 = vsel %vm2140_vm7, %v948_v50, %v955_v52  ;;  %v968_v55 = vsel %vm2272_vm1, %v957_v53, %v967_v49 }
 0x24b   : > { %966 = vst [vmem:[#allocation3 + $0x4] sm:$0xf] %v956_v54  ;;  %969 = vst [vmem:[#allocation3 + $0x8] sm:$0x1] %v968_v55 }
 0x250   : > { %v971_v57 = vld [vmem:[#allocation3] sm:$0xf] }
 0x251   : > { %v1207_v13 = vld [vmem:[#allocation3] sm:$0xe] }
 0x252   : > { %v972_v58 = vld [vmem:[#allocation3 + $0x4] sm:$0xf]  ;;  %v1885_v60 = vld [vmem:[#allocation3 + $0x8] ss:$0 sps:$4 sm:$0x11]  }
 0x253   : > { %v1532_v59 = vcombine.low %v971_v57, %v972_v58  ;;  %v1023_v62 = vshll.u32 %v1885_v60, 16  ;;  %v1566_v15 = vcombine.low %v1207_v13, %v972_v58  ;;  %v1229_v18 = vrot.slane %v1885_v60, 1 }
 0x255   : > { %1755 = vmatmul.mubr.bf16.vlgmr.msra.gmra.mrb[16].mxu1 %v1532_v59  ;;  %v1018_v61 = vshll.u32 %v1532_v59, 16  ;;  %v1016_v63 = vshrl.u32 %v1532_v59, 16  ;;  %v1025_v3 = vrot.slane %v1023_v62, 1  ;;  %v1228_v17 = vrot.slane %v1566_v15, 1 }
 0x257   : > { %v1020_v0 = vrot.slane %v1018_v61, 1  ;;  %v1230_v20 = vsel %vm545_vm12, %v1228_v17, %v1229_v18 }
 0x259   : > { %v1021_v2 = vor.u32 %v1020_v0, %v1016_v63 }
 0x25b   : > { %v1026_v56 = vsel %vm383_vm11, %v1021_v2, %v1025_v3 }
 0x25c   : > { %1735 = vmatmul.mubr.bf16.vlgmr.msra.gmra.mrb[4].mxu0 %v1026_v56 }
 0x25d   : > { %1759 = vmatpush3.bf16.msra.mxu0 %v1886_v14  ;;  %1774 = vmatprep.mubr.msk.bf16.mxu0 %vm1980_vm0, %v1979_v1 }
 0x25e   : > { %1760 = vmatprep.subr.bf16.mxu0 %v1979_v1 }
 0x261   : > { %1761 = vmatpush3.bf16.msra.mxu0 %v1887_v4 }
 0x262   : > { %1762 = vmatprep.subr.bf16.mxu0 %v1979_v1 }
 0x265   : > { %1763 = vmatpush3.bf16.msra.mxu0 %v1888_v5 }
 0x266   : > { %1764 = vmatprep.subr.bf16.mxu0 %v1979_v1 }
 0x269   : > { %1765 = vmatpush3.bf16.msra.mxu0 %v1889_v7 }
 0x26a   : > { %1766 = vmatprep.subr.bf16.mxu0 %v1979_v1 }
 0x26d   : > { %1767 = vmatpush3.bf16.msra.mxu0 %v1890_v8 }
 0x26e   : > { %1768 = vmatprep.subr.bf16.mxu0 %v1979_v1 }
 0x271   : > { %1769 = vmatpush3.bf16.msra.mxu0 %v1891_v11 }
 0x272   : > { %1770 = vmatprep.subr.bf16.mxu0 %v1979_v1 }
 0x275   : > { %1771 = vmatpush3.bf16.msra.mxu0 %v1892_v12 }
 0x276   : > { %1772 = vmatprep.subr.bf16.mxu0 %v1979_v1  ;;  %v1575_v1 = vld [vmem:[%s2446_s6] ss:$0 sm:$0xff] }
 0x279   : > { %1773 = vmatpush3.bf16.msra.mxu0 %v1893_v16 }
 0x27c   : > { %1775 = vmatmul.mubr.bf16.vlgmr.msra.gmra.mrb[8].mxu0 %v1230_v20 }
 0x328   : > { %v1200_v21 = vpop.f32.mrb[16].mxu1 }
 0x329   : > { %v1756_v22 = vpop.f32.mrb[17].mxu1 }
 0x32a   : > { %v1203_v23 = vpop.f32.mrb[18].mxu1 }
 0x32b   : > { %v1757_v24 = vpop.f32.mrb[19].mxu1 }
 0x32f   : > { %v1110_v25 = vpop.f32.mrb[4].mxu0 }
 0x330   : > { %v1201_v26 = vadd.f32 %v1200_v21, %v1110_v25  ;;  %v1736_v27 = vpop.f32.mrb[5].mxu0 }
 0x331   : > { %v1113_v28 = vpop.f32.mrb[6].mxu0 }
 0x332   : > { %v1204_v29 = vadd.f32 %v1203_v23, %v1113_v28  ;;  %v1737_v30 = vpop.f32.mrb[7].mxu0 }
 0x34f   : > { %v1314_v31 = vpop.f32.mrb[8].mxu0 }
 0x350   : > { %v1321_v32 = vadd.f32 %v1314_v31, %v1201_v26  ;;  %v1776_v33 = vpop.f32.mrb[9].mxu0 }
 0x351   : > { %v1317_v36 = vpop.f32.mrb[10].mxu0 }
 0x352   : > { %v1329_v37 = vadd.f32 %v1575_v1, %v1321_v32  ;;  %v1322_v38 = vadd.f32 %v1317_v36, %v1204_v29  ;;  %v1777_v19 = vpop.f32.mrb[11].mxu0 }
 0x354   : > { %vm1331_vm0 = vcmp.gt.f32.partialorder %v1329_v37, 0.0  ;;  %v1334_v34 = vmul.f32 %v1333_v35, %v1329_v37  ;;  %v1330_v39 = vadd.f32 %v1575_v1, %v1322_v38 }
 0x356   : > { %v1336_v40 = vsel %vm1331_vm0, %v1329_v37, %v1334_v34  ;;  %vm1332_vm5 = vcmp.gt.f32.partialorder %v1330_v39, 0.0  ;;  %v1335_v41 = vmul.f32 %v1333_v35, %v1330_v39 }
 0x357   : > { %v1338_v6 = vadd.f32 %v1336_v40, %v2127_v9 }
 0x358   : > { %v1337_v42 = vsel %vm1332_vm5, %v1330_v39, %v1335_v41 }
 0x359   : > { %v1339_v43 = vadd.f32 %v1337_v42, %v2129_v10  ;;  %1340 = vst.msk [vmem:[%s285_s18] sm:$0xff] %vm420_vm10, %v1338_v6 }
 0x35b   : > { %1341 = vst.msk [vmem:[%s285_s18 + $0x8] sm:$0xff] %vm420_vm10, %v1339_v43 }
 0x35c   : > { %1923 = shalt.err (!%p1920_p2)
}
 0x35d   : > { %s1924_s13 = scalar_lea.hbm %s2392_s22, 256  ;;  %s1928_s16 = scalar_lea.hbm %s2447_s7, 512 }
 0x35e   : > { %p1925_p3 = scmp.ne.s32.totalorder %s2392_s22, %s1924_s13  ;;  %p1929_p8 = scmp.lt.u32.totalorder %s2392_s22, %s2447_s7 }
 0x35f   : > { %p1930_p9 = scmp.lt.u32.totalorder %s1928_s16, %s1924_s13  ;;  %p1932_p11 = scmp.lt.u32.totalorder %s1924_s13, %s2392_s22 }
 0x360   : > { %p1926_p4 = pnand %p1925_p3, %p2062_p5 }
 0x361   : > { %p1931_p10 = por %p1930_p9, %p1929_p8 }
 0x362   : > { %p1927_p7 = pneg %p1926_p4 }
 0x363   : > { %p1933_p12 = por %p1932_p11, %p1931_p10 }
 0x365   : > { %p1934_p13 = pnand %p1933_p12, %p1927_p7 }
 0x367   : > { %1937 = shalt.err (!%p1934_p13)
}
 0x368   : > { %s1982_s20 = smov 128   ;;  %s1983_s21 = smov 8  }
 0x369   : > { %1788 = dma.vmem_to_hbm [thread:$0]  (%p2062_p5), %s2394_s19, 256, %s2392_s22, %s2399_s28, %s1982_s20, %s1982_s20, %s1983_s21  }
 0x36a PF: > { %p1800_p0 = scmp.ge.s32.totalorder %s1976_s27, 2  ;;  %s1371_s23 = sand.u32 1, %s1964_s24  }
 0x36b   : > { %s1372_s29 = scalar_lea.sflag [#allocation5], %s1371_s23 }
 0x36c   : > { %p1795_p1 = pnand %p1800_p0, %p2066_p6 }
 0x36e   : > { %1959 = dma.done.wait (!%p1795_p1), %s1372_s29, 256  }
 0x36f   : > { %1961 = vsyncadd (!%p1795_p1), %s1372_s29, 4294967040  ;;  %p18_p2 = scmp.ge.s32.totalorder %s2049_s30, 4   ;;  %s2459_s24 = smov %s1968_s25 }
 0x370   : > { %s2460_s25 = smov %s1972_s26  ;;  %s2461_s26 = smov %s2060_s10 }
 0x371   : > { %s2462_s27 = smov %s2049_s30  ;;  %20 = sbr.rel (!%p18_p2) target bundleno = 4 (0x4), region = 94 }
 0x378   :  { %1377 = vsyncpa [#allocation5], 1 }
 0x379   :  { %1379 = vsyncpa [#allocation5 + $0x1], 1 }
 0x37a   :  { %1380 = vsyncpa [#allocation6], 1 }
 0x37b   :  { %1382 = vsyncpa [#allocation6 + $0x1], 1 }

</bundles_post_ra>
